<compile_context>
chip_gen: v6e
topology: v6e:2x2x1
jax: 0.10.0
libtpu: 0.0.40
codegen_flags: <defaults>
</compile_context>

<pallas_src>
import jax
import jax.numpy as jnp
from jax.experimental import pallas as pl
from jax.experimental.pallas import tpu as pltpu


def fairness_loss_kernel(logits_ref, labels_ref, sens_ref, n_ref, alpha_ref,
                         out_ref,
                         acc_ce, acc_n1, acc_sp, acc_s1,
                         acc_cl, acc_c1, acc_tt, acc_t1):
    i = pl.program_id(0)
    accs = (acc_ce, acc_n1, acc_sp, acc_s1, acc_cl, acc_c1, acc_tt, acc_t1)

    @pl.when(i == 0)
    def _init():
        for a in accs:
            a[...] = jnp.zeros_like(a)

    C = logits_ref.shape[0]                    # classes
    tr, tl = labels_ref.shape                  # (tile_rows, 128) lane-dense tile
    n = n_ref[0]                               # global batch size (SMEM scalar)

    labels = labels_ref[...].astype(jnp.int32)  # int8 on the wire, int32 in vregs
    sens = sens_ref[...].astype(jnp.int32)

    # Global sample index of every element in this tile; mask for padded /
    # partial-edge-block columns.
    row_idx = jax.lax.broadcasted_iota(jnp.int32, (tr, tl), 0)
    lane_idx = jax.lax.broadcasted_iota(jnp.int32, (tr, tl), 1)
    col = i * (tr * tl) + row_idx * tl + lane_idx
    valid = col < n
    valid_f = valid.astype(jnp.float32)

    # Per-class (tile_rows, 128) rows; f32 in-kernel (v5e VPU/EUP have no bf16),
    # pre-masked so garbage in partial blocks cannot produce Inf/NaN.
    rows = [jnp.where(valid, logits_ref[c].astype(jnp.float32), 0.0)
            for c in range(C)]

    # ---- cross entropy (per-sample, masked) --------------------------------
    row_max = rows[0]
    for c in range(1, C):
        row_max = jnp.maximum(row_max, rows[c])

    sum_exp = jnp.zeros_like(row_max)
    picked = jnp.zeros_like(row_max)
    for c in range(C):
        sum_exp = sum_exp + jnp.exp(rows[c] - row_max)
        picked = picked + jnp.where(labels == c, rows[c], 0.0)
    ce_row = (jnp.log(sum_exp) + row_max - picked) * valid_f

    # ---- pred == 1 with first-max (torch argmax) tie-breaking --------------
    if C >= 2:
        pred1 = jnp.logical_and(rows[1] == row_max, rows[0] < row_max)
        pred1v = jnp.logical_and(pred1, valid).astype(jnp.float32)
    else:
        pred1v = jnp.zeros_like(row_max)

    g1v = jnp.logical_and(sens == 1, valid).astype(jnp.float32)
    lab1v = jnp.logical_and(labels == 1, valid).astype(jnp.float32)
    pl1v = pred1v * lab1v

    # ---- lane/sublane-dense partial sums (reduced once, at the last step) --
    acc_ce[...] += ce_row                 # sum of per-sample CE
    acc_n1[...] += g1v                    # |group 1|
    acc_sp[...] += pred1v                 # |pred==1| (all valid samples)
    acc_s1[...] += pred1v * g1v           # |pred==1 & group 1|
    acc_cl[...] += lab1v                  # |label==1|
    acc_c1[...] += lab1v * g1v            # |label==1 & group 1|
    acc_tt[...] += pl1v                   # |pred==1 & label==1|
    acc_t1[...] += pl1v * g1v             # |pred==1 & label==1 & group 1|

    @pl.when(i == pl.num_programs(0) - 1)
    def _finalize():
        def tot(a):                        # (tile_rows, 128) -> (1, 1)
            s = jnp.sum(a[...], axis=0, keepdims=True)
            return jnp.sum(s, axis=1, keepdims=True)

        ce_sum = tot(acc_ce)
        n1 = tot(acc_n1)
        sp = tot(acc_sp)
        s1 = tot(acc_s1)
        cl = tot(acc_cl)
        c1 = tot(acc_c1)
        tt = tot(acc_tt)
        t1 = tot(acc_t1)

        n_f = n.astype(jnp.float32)
        # group-0 stats derived from totals (sens is binary & valid-masked)
        n0 = n_f - n1
        s0 = sp - s1
        c0 = cl - c1
        t0 = tt - t1

        ce = ce_sum / n_f                                # mean over global N
        rate0 = s0 / jnp.maximum(n0, 1.0)
        rate1 = s1 / jnp.maximum(n1, 1.0)
        spd = jnp.abs(rate0 - rate1)
        tpr0 = jnp.where(c0 > 0, t0 / jnp.maximum(c0, 1.0), 0.0)
        tpr1 = jnp.where(c1 > 0, t1 / jnp.maximum(c1, 1.0), 0.0)
        eod = jnp.abs(tpr0 - tpr1)

        alpha = alpha_ref[0]                             # SMEM scalar
        out_ref[...] = ce + alpha * (spd + eod)


def _round_up(x, m):
    return (x + m - 1) // m * m


def fairness_loss(logits, labels, sensitive_attr, alpha=0.1, *, tile_n=131072):
    """logits: (N, C) float; labels: (N,) int; sensitive_attr: (N,) int in {0,1}."""
    N, C = logits.shape

    # Pad only to the next multiple of 128 (required for the free (rows, 128)
    # reshape); partial edge blocks + the in-kernel mask handle the rest, so no
    # pad-to-tile-multiple HBM copies.
    n128 = _round_up(N, 128)
    pad = n128 - N
    rows_total = n128 // 128

    logits_p = jnp.pad(logits, ((0, pad), (0, 0))) if pad else logits
    # Lane-dense layout: lanes = 128 samples, sublanes = sample-rows.
    logits_t = jnp.transpose(logits_p).reshape(C, rows_total, 128)

    labels_p = labels.astype(jnp.int8)
    sens_p = sensitive_attr.astype(jnp.int8)
    if pad:
        labels_p = jnp.pad(labels_p, (0, pad))
        sens_p = jnp.pad(sens_p, (0, pad))
    labels_r = labels_p.reshape(rows_total, 128)
    sens_r = sens_p.reshape(rows_total, 128)

    # Batch tile: tile_n samples -> tile_n/128 sublane rows (multiple of 8).
    desired_rows = _round_up(max(tile_n, 128) // 128, 8)
    tile_rows = min(desired_rows, rows_total)
    grid = (pl.cdiv(rows_total, tile_rows),)

    n_arr = jnp.array([N], dtype=jnp.int32)
    alpha_arr = jnp.array([alpha], dtype=jnp.float32)

    # VMEM per step at tile_rows=1024, C=4, f32 logits:
    #   logits 2x2 MiB + labels/sens int8 2x2x128 KiB + 8 accumulators 4 MiB
    #   ~= 8.5 MiB  -> fits scoped defaults on v5e/v6e/v7x.
    out = pl.pallas_call(
        fairness_loss_kernel,
        out_shape=jax.ShapeDtypeStruct((1, 1), jnp.float32),
        grid=grid,
        in_specs=[
            pl.BlockSpec((C, tile_rows, 128), lambda i: (0, i, 0)),   # logits (C, rows, 128)
            pl.BlockSpec((tile_rows, 128), lambda i: (i, 0)),         # labels int8
            pl.BlockSpec((tile_rows, 128), lambda i: (i, 0)),         # sensitive attr int8
            pl.BlockSpec(memory_space=pltpu.MemorySpace.SMEM),        # global N
            pl.BlockSpec(memory_space=pltpu.MemorySpace.SMEM),        # alpha
        ],
        out_specs=pl.BlockSpec((1, 1), lambda i: (0, 0)),
        scratch_shapes=[pltpu.VMEM((tile_rows, 128), jnp.float32)
                        for _ in range(8)],
        compiler_params=pltpu.CompilerParams(
            dimension_semantics=("arbitrary",)),
    )(logits_t, labels_r, sens_r, n_arr, alpha_arr)
    return out[0, 0]


def _reference(logits, labels, sens, alpha=0.1):
    # pure-JAX reference (binary groups {0,1}), used as silent correctness check
    logits = logits.astype(jnp.float32)
    lse = jax.nn.logsumexp(logits, axis=-1)
    picked = jnp.take_along_axis(logits, labels[:, None], axis=-1)[:, 0]
    ce = jnp.mean(lse - picked)
    preds = jnp.argmax(logits, axis=-1)
    pred1 = (preds == 1).astype(jnp.float32)
    g0 = (sens == 0).astype(jnp.float32)
    g1 = (sens == 1).astype(jnp.float32)
    lab1 = (labels == 1).astype(jnp.float32)
    rate0 = jnp.sum(pred1 * g0) / jnp.maximum(jnp.sum(g0), 1.0)
    rate1 = jnp.sum(pred1 * g1) / jnp.maximum(jnp.sum(g1), 1.0)
    spd = jnp.abs(rate0 - rate1)
    c0, c1 = jnp.sum(g0 * lab1), jnp.sum(g1 * lab1)
    tpr0 = jnp.where(c0 > 0, jnp.sum(pred1 * g0 * lab1) / jnp.maximum(c0, 1.0), 0.0)
    tpr1 = jnp.where(c1 > 0, jnp.sum(pred1 * g1 * lab1) / jnp.maximum(c1, 1.0), 0.0)
    eod = jnp.abs(tpr0 - tpr1)
    return ce + alpha * (spd + eod)


if __name__ == "__main__":
    key = jax.random.PRNGKey(0)
    k_logits, k_labels = jax.random.split(key)

    N, C = 8, 4  # batch=8, AGNews-style 4 classes
    logits = jax.random.normal(k_logits, (N, C), dtype=jnp.float32)
    labels = jax.random.randint(k_labels, (N,), 0, C, dtype=jnp.int32)
    # deterministic binary sensitive attribute with both groups present
    sensitive_attr = jnp.array([0, 1, 0, 1, 1, 0, 0, 1], dtype=jnp.int32)

    out = fairness_loss(logits, labels, sensitive_attr, alpha=0.1)
    out = jax.block_until_ready(out)

    ref = jax.block_until_ready(_reference(logits, labels, sensitive_attr, alpha=0.1))
    assert jnp.allclose(out, ref, atol=1e-5, rtol=1e-5), (out, ref)

    print("KERNEL_OK")
</pallas_src>

<mosaic_0001>
module attributes {stable_mosaic.version = 11 : i64} {
  func.func @fairness_loss_kernel(%arg0: i32, %arg1: memref<4x1x128xf32, #tpu.memory_space<vmem>>, %arg2: memref<1x128xi8, #tpu.memory_space<vmem>>, %arg3: memref<1x128xi8, #tpu.memory_space<vmem>>, %arg4: memref<1xi32, #tpu.memory_space<smem>>, %arg5: memref<1xf32, #tpu.memory_space<smem>>, %arg6: memref<1x1xf32, #tpu.memory_space<vmem>>, %arg7: memref<1x128xf32, #tpu.memory_space<vmem>>, %arg8: memref<1x128xf32, #tpu.memory_space<vmem>>, %arg9: memref<1x128xf32, #tpu.memory_space<vmem>>, %arg10: memref<1x128xf32, #tpu.memory_space<vmem>>, %arg11: memref<1x128xf32, #tpu.memory_space<vmem>>, %arg12: memref<1x128xf32, #tpu.memory_space<vmem>>, %arg13: memref<1x128xf32, #tpu.memory_space<vmem>>, %arg14: memref<1x128xf32, #tpu.memory_space<vmem>>) attributes {dimension_semantics = [#tpu.dimension_semantics<arbitrary>], iteration_bounds = array<i64: 1>, scalar_prefetch = 0 : i64, scratch_operands = 8 : i64, tpu.core_type = #tpu.core_type<tc>, window_params = [{transform_indices = @transform_0, window_bounds = array<i64: 4, 1, 128>}, {transform_indices = @transform_1, window_bounds = array<i64: 1, 128>}, {transform_indices = @transform_2, window_bounds = array<i64: 1, 128>}, {transform_indices = @transform_3, window_bounds = array<i64: 1>}, {transform_indices = @transform_4, window_bounds = array<i64: 1>}, {pipeline_mode = #tpu.pipeline_mode<synchronous>, transform_indices = @transform_5, window_bounds = array<i64: 1, 1>}]} {
    %c0_i32 = arith.constant 0 : i32
    %0 = arith.cmpi eq, %arg0, %c0_i32 : i32
    %1 = arith.extui %0 : i1 to i32
    %c0_i32_0 = arith.constant 0 : i32
    %2 = arith.cmpi ne, %1, %c0_i32_0 : i32
    scf.if %2 {
      %cst_61 = arith.constant 0.000000e+00 : f32
      %124 = vector.broadcast %cst_61 : f32 to vector<1x128xf32>
      %c0_62 = arith.constant 0 : index
      %c0_63 = arith.constant 0 : index
      %125 = vector.load %arg7[%c0_62, %c0_63] : memref<1x128xf32, #tpu.memory_space<vmem>>, vector<1x128xf32>
      tpu.vector_store %arg7[%c0_62, %c0_63], %124 {strides = array<i32>} : memref<1x128xf32, #tpu.memory_space<vmem>>, vector<1x128xf32>,
      %cst_64 = arith.constant 0.000000e+00 : f32
      %126 = vector.broadcast %cst_64 : f32 to vector<1x128xf32>
      %c0_65 = arith.constant 0 : index
      %c0_66 = arith.constant 0 : index
      %127 = vector.load %arg8[%c0_65, %c0_66] : memref<1x128xf32, #tpu.memory_space<vmem>>, vector<1x128xf32>
      tpu.vector_store %arg8[%c0_65, %c0_66], %126 {strides = array<i32>} : memref<1x128xf32, #tpu.memory_space<vmem>>, vector<1x128xf32>,
      %cst_67 = arith.constant 0.000000e+00 : f32
      %128 = vector.broadcast %cst_67 : f32 to vector<1x128xf32>
      %c0_68 = arith.constant 0 : index
      %c0_69 = arith.constant 0 : index
      %129 = vector.load %arg9[%c0_68, %c0_69] : memref<1x128xf32, #tpu.memory_space<vmem>>, vector<1x128xf32>
      tpu.vector_store %arg9[%c0_68, %c0_69], %128 {strides = array<i32>} : memref<1x128xf32, #tpu.memory_space<vmem>>, vector<1x128xf32>,
      %cst_70 = arith.constant 0.000000e+00 : f32
      %130 = vector.broadcast %cst_70 : f32 to vector<1x128xf32>
      %c0_71 = arith.constant 0 : index
      %c0_72 = arith.constant 0 : index
      %131 = vector.load %arg10[%c0_71, %c0_72] : memref<1x128xf32, #tpu.memory_space<vmem>>, vector<1x128xf32>
      tpu.vector_store %arg10[%c0_71, %c0_72], %130 {strides = array<i32>} : memref<1x128xf32, #tpu.memory_space<vmem>>, vector<1x128xf32>,
      %cst_73 = arith.constant 0.000000e+00 : f32
      %132 = vector.broadcast %cst_73 : f32 to vector<1x128xf32>
      %c0_74 = arith.constant 0 : index
      %c0_75 = arith.constant 0 : index
      %133 = vector.load %arg11[%c0_74, %c0_75] : memref<1x128xf32, #tpu.memory_space<vmem>>, vector<1x128xf32>
      tpu.vector_store %arg11[%c0_74, %c0_75], %132 {strides = array<i32>} : memref<1x128xf32, #tpu.memory_space<vmem>>, vector<1x128xf32>,
      %cst_76 = arith.constant 0.000000e+00 : f32
      %134 = vector.broadcast %cst_76 : f32 to vector<1x128xf32>
      %c0_77 = arith.constant 0 : index
      %c0_78 = arith.constant 0 : index
      %135 = vector.load %arg12[%c0_77, %c0_78] : memref<1x128xf32, #tpu.memory_space<vmem>>, vector<1x128xf32>
      tpu.vector_store %arg12[%c0_77, %c0_78], %134 {strides = array<i32>} : memref<1x128xf32, #tpu.memory_space<vmem>>, vector<1x128xf32>,
      %cst_79 = arith.constant 0.000000e+00 : f32
      %136 = vector.broadcast %cst_79 : f32 to vector<1x128xf32>
      %c0_80 = arith.constant 0 : index
      %c0_81 = arith.constant 0 : index
      %137 = vector.load %arg13[%c0_80, %c0_81] : memref<1x128xf32, #tpu.memory_space<vmem>>, vector<1x128xf32>
      tpu.vector_store %arg13[%c0_80, %c0_81], %136 {strides = array<i32>} : memref<1x128xf32, #tpu.memory_space<vmem>>, vector<1x128xf32>,
      %cst_82 = arith.constant 0.000000e+00 : f32
      %138 = vector.broadcast %cst_82 : f32 to vector<1x128xf32>
      %c0_83 = arith.constant 0 : index
      %c0_84 = arith.constant 0 : index
      %139 = vector.load %arg14[%c0_83, %c0_84] : memref<1x128xf32, #tpu.memory_space<vmem>>, vector<1x128xf32>
      tpu.vector_store %arg14[%c0_83, %c0_84], %138 {strides = array<i32>} : memref<1x128xf32, #tpu.memory_space<vmem>>, vector<1x128xf32>,
    } else {
    }
    %c0 = arith.constant 0 : index
    %3 = memref.load %arg4[%c0] : memref<1xi32, #tpu.memory_space<smem>>
    %c0_1 = arith.constant 0 : index
    %c0_2 = arith.constant 0 : index
    %4 = vector.load %arg2[%c0_1, %c0_2] : memref<1x128xi8, #tpu.memory_space<vmem>>, vector<1x128xi8>
    %5 = arith.extsi %4 : vector<1x128xi8> to vector<1x128xi32>
    %c0_3 = arith.constant 0 : index
    %c0_4 = arith.constant 0 : index
    %6 = vector.load %arg3[%c0_3, %c0_4] : memref<1x128xi8, #tpu.memory_space<vmem>>, vector<1x128xi8>
    %7 = arith.extsi %6 : vector<1x128xi8> to vector<1x128xi32>
    %8 = tpu.iota {dimensions = array<i32: 0>} : vector<1x128xi32>
    %9 = tpu.iota {dimensions = array<i32: 1>} : vector<1x128xi32>
    %c128_i32 = arith.constant 128 : i32
    %10 = arith.muli %arg0, %c128_i32 : i32
    %c128_i32_5 = arith.constant 128 : i32
    %11 = vector.broadcast %c128_i32_5 : i32 to vector<1x128xi32>
    %12 = arith.muli %8, %11 : vector<1x128xi32>
    %13 = vector.broadcast %10 : i32 to vector<1x128xi32>
    %14 = arith.addi %13, %12 : vector<1x128xi32>
    %15 = arith.addi %14, %9 : vector<1x128xi32>
    %16 = vector.broadcast %3 : i32 to vector<1x128xi32>
    %17 = arith.cmpi slt, %15, %16 : vector<1x128xi32>
    %18 = arith.extui %17 : vector<1x128xi1> to vector<1x128xi32>
    %19 = arith.sitofp %18 : vector<1x128xi32> to vector<1x128xf32>
    %c0_6 = arith.constant 0 : index
    %c0_7 = arith.constant 0 : index
    %c0_8 = arith.constant 0 : index
    %20 = vector.load %arg1[%c0_6, %c0_7, %c0_8] : memref<4x1x128xf32, #tpu.memory_space<vmem>>, vector<1x1x128xf32>
    %21 = vector.shape_cast %20 : vector<1x1x128xf32> to vector<1x128xf32>
    %cst = arith.constant 0.000000e+00 : f32
    %22 = vector.broadcast %cst : f32 to vector<1x128xf32>
    %23 = arith.select %17, %21, %22 : vector<1x128xi1>, vector<1x128xf32>
    %c1 = arith.constant 1 : index
    %c0_9 = arith.constant 0 : index
    %c0_10 = arith.constant 0 : index
    %24 = vector.load %arg1[%c1, %c0_9, %c0_10] : memref<4x1x128xf32, #tpu.memory_space<vmem>>, vector<1x1x128xf32>
    %25 = vector.shape_cast %24 : vector<1x1x128xf32> to vector<1x128xf32>
    %cst_11 = arith.constant 0.000000e+00 : f32
    %26 = vector.broadcast %cst_11 : f32 to vector<1x128xf32>
    %27 = arith.select %17, %25, %26 : vector<1x128xi1>, vector<1x128xf32>
    %c2 = arith.constant 2 : index
    %c0_12 = arith.constant 0 : index
    %c0_13 = arith.constant 0 : index
    %28 = vector.load %arg1[%c2, %c0_12, %c0_13] : memref<4x1x128xf32, #tpu.memory_space<vmem>>, vector<1x1x128xf32>
    %29 = vector.shape_cast %28 : vector<1x1x128xf32> to vector<1x128xf32>
    %cst_14 = arith.constant 0.000000e+00 : f32
    %30 = vector.broadcast %cst_14 : f32 to vector<1x128xf32>
    %31 = arith.select %17, %29, %30 : vector<1x128xi1>, vector<1x128xf32>
    %c3 = arith.constant 3 : index
    %c0_15 = arith.constant 0 : index
    %c0_16 = arith.constant 0 : index
    %32 = vector.load %arg1[%c3, %c0_15, %c0_16] : memref<4x1x128xf32, #tpu.memory_space<vmem>>, vector<1x1x128xf32>
    %33 = vector.shape_cast %32 : vector<1x1x128xf32> to vector<1x128xf32>
    %cst_17 = arith.constant 0.000000e+00 : f32
    %34 = vector.broadcast %cst_17 : f32 to vector<1x128xf32>
    %35 = arith.select %17, %33, %34 : vector<1x128xi1>, vector<1x128xf32>
    %36 = arith.maximumf %23, %27 : vector<1x128xf32>
    %37 = arith.maximumf %36, %31 : vector<1x128xf32>
    %38 = arith.maximumf %37, %35 : vector<1x128xf32>
    %cst_18 = arith.constant 0.000000e+00 : f32
    %39 = vector.broadcast %cst_18 : f32 to vector<1x128xf32>
    %cst_19 = arith.constant 0.000000e+00 : f32
    %40 = vector.broadcast %cst_19 : f32 to vector<1x128xf32>
    %41 = arith.subf %23, %38 : vector<1x128xf32>
    %42 = math.exp %41 : vector<1x128xf32>
    %43 = arith.addf %39, %42 : vector<1x128xf32>
    %c0_i32_20 = arith.constant 0 : i32
    %44 = vector.broadcast %c0_i32_20 : i32 to vector<1x128xi32>
    %45 = arith.cmpi eq, %5, %44 : vector<1x128xi32>
    %cst_21 = arith.constant 0.000000e+00 : f32
    %46 = vector.broadcast %cst_21 : f32 to vector<1x128xf32>
    %47 = arith.select %45, %23, %46 : vector<1x128xi1>, vector<1x128xf32>
    %48 = arith.addf %40, %47 : vector<1x128xf32>
    %49 = arith.subf %27, %38 : vector<1x128xf32>
    %50 = math.exp %49 : vector<1x128xf32>
    %51 = arith.addf %43, %50 : vector<1x128xf32>
    %c1_i32 = arith.constant 1 : i32
    %52 = vector.broadcast %c1_i32 : i32 to vector<1x128xi32>
    %53 = arith.cmpi eq, %5, %52 : vector<1x128xi32>
    %cst_22 = arith.constant 0.000000e+00 : f32
    %54 = vector.broadcast %cst_22 : f32 to vector<1x128xf32>
    %55 = arith.select %53, %27, %54 : vector<1x128xi1>, vector<1x128xf32>
    %56 = arith.addf %48, %55 : vector<1x128xf32>
    %57 = arith.subf %31, %38 : vector<1x128xf32>
    %58 = math.exp %57 : vector<1x128xf32>
    %59 = arith.addf %51, %58 : vector<1x128xf32>
    %c2_i32 = arith.constant 2 : i32
    %60 = vector.broadcast %c2_i32 : i32 to vector<1x128xi32>
    %61 = arith.cmpi eq, %5, %60 : vector<1x128xi32>
    %cst_23 = arith.constant 0.000000e+00 : f32
    %62 = vector.broadcast %cst_23 : f32 to vector<1x128xf32>
    %63 = arith.select %61, %31, %62 : vector<1x128xi1>, vector<1x128xf32>
    %64 = arith.addf %56, %63 : vector<1x128xf32>
    %65 = arith.subf %35, %38 : vector<1x128xf32>
    %66 = math.exp %65 : vector<1x128xf32>
    %67 = arith.addf %59, %66 : vector<1x128xf32>
    %c3_i32 = arith.constant 3 : i32
    %68 = vector.broadcast %c3_i32 : i32 to vector<1x128xi32>
    %69 = arith.cmpi eq, %5, %68 : vector<1x128xi32>
    %cst_24 = arith.constant 0.000000e+00 : f32
    %70 = vector.broadcast %cst_24 : f32 to vector<1x128xf32>
    %71 = arith.select %69, %35, %70 : vector<1x128xi1>, vector<1x128xf32>
    %72 = arith.addf %64, %71 : vector<1x128xf32>
    %73 = math.log %67 : vector<1x128xf32>
    %74 = arith.addf %73, %38 : vector<1x128xf32>
    %75 = arith.subf %74, %72 : vector<1x128xf32>
    %76 = arith.mulf %75, %19 : vector<1x128xf32>
    %77 = arith.cmpf oeq, %27, %38 : vector<1x128xf32>
    %78 = arith.cmpf olt, %23, %38 : vector<1x128xf32>
    %79 = arith.andi %77, %78 : vector<1x128xi1>
    %80 = arith.andi %79, %17 : vector<1x128xi1>
    %81 = arith.extui %80 : vector<1x128xi1> to vector<1x128xi32>
    %82 = arith.sitofp %81 : vector<1x128xi32> to vector<1x128xf32>
    %c1_i32_25 = arith.constant 1 : i32
    %83 = vector.broadcast %c1_i32_25 : i32 to vector<1x128xi32>
    %84 = arith.cmpi eq, %7, %83 : vector<1x128xi32>
    %85 = arith.andi %84, %17 : vector<1x128xi1>
    %86 = arith.extui %85 : vector<1x128xi1> to vector<1x128xi32>
    %87 = arith.sitofp %86 : vector<1x128xi32> to vector<1x128xf32>
    %c1_i32_26 = arith.constant 1 : i32
    %88 = vector.broadcast %c1_i32_26 : i32 to vector<1x128xi32>
    %89 = arith.cmpi eq, %5, %88 : vector<1x128xi32>
    %90 = arith.andi %89, %17 : vector<1x128xi1>
    %91 = arith.extui %90 : vector<1x128xi1> to vector<1x128xi32>
    %92 = arith.sitofp %91 : vector<1x128xi32> to vector<1x128xf32>
    %93 = arith.mulf %82, %92 : vector<1x128xf32>
    %c0_27 = arith.constant 0 : index
    %c0_28 = arith.constant 0 : index
    %94 = vector.load %arg7[%c0_27, %c0_28] : memref<1x128xf32, #tpu.memory_space<vmem>>, vector<1x128xf32>
    %95 = arith.addf %94, %76 : vector<1x128xf32>
    %c0_29 = arith.constant 0 : index
    %c0_30 = arith.constant 0 : index
    %96 = vector.load %arg7[%c0_29, %c0_30] : memref<1x128xf32, #tpu.memory_space<vmem>>, vector<1x128xf32>
    tpu.vector_store %arg7[%c0_29, %c0_30], %95 {strides = array<i32>} : memref<1x128xf32, #tpu.memory_space<vmem>>, vector<1x128xf32>,
    %c0_31 = arith.constant 0 : index
    %c0_32 = arith.constant 0 : index
    %97 = vector.load %arg8[%c0_31, %c0_32] : memref<1x128xf32, #tpu.memory_space<vmem>>, vector<1x128xf32>
    %98 = arith.addf %97, %87 : vector<1x128xf32>
    %c0_33 = arith.constant 0 : index
    %c0_34 = arith.constant 0 : index
    %99 = vector.load %arg8[%c0_33, %c0_34] : memref<1x128xf32, #tpu.memory_space<vmem>>, vector<1x128xf32>
    tpu.vector_store %arg8[%c0_33, %c0_34], %98 {strides = array<i32>} : memref<1x128xf32, #tpu.memory_space<vmem>>, vector<1x128xf32>,
    %c0_35 = arith.constant 0 : index
    %c0_36 = arith.constant 0 : index
    %100 = vector.load %arg9[%c0_35, %c0_36] : memref<1x128xf32, #tpu.memory_space<vmem>>, vector<1x128xf32>
    %101 = arith.addf %100, %82 : vector<1x128xf32>
    %c0_37 = arith.constant 0 : index
    %c0_38 = arith.constant 0 : index
    %102 = vector.load %arg9[%c0_37, %c0_38] : memref<1x128xf32, #tpu.memory_space<vmem>>, vector<1x128xf32>
    tpu.vector_store %arg9[%c0_37, %c0_38], %101 {strides = array<i32>} : memref<1x128xf32, #tpu.memory_space<vmem>>, vector<1x128xf32>,
    %c0_39 = arith.constant 0 : index
    %c0_40 = arith.constant 0 : index
    %103 = vector.load %arg10[%c0_39, %c0_40] : memref<1x128xf32, #tpu.memory_space<vmem>>, vector<1x128xf32>
    %104 = arith.mulf %82, %87 : vector<1x128xf32>
    %105 = arith.addf %103, %104 : vector<1x128xf32>
    %c0_41 = arith.constant 0 : index
    %c0_42 = arith.constant 0 : index
    %106 = vector.load %arg10[%c0_41, %c0_42] : memref<1x128xf32, #tpu.memory_space<vmem>>, vector<1x128xf32>
    tpu.vector_store %arg10[%c0_41, %c0_42], %105 {strides = array<i32>} : memref<1x128xf32, #tpu.memory_space<vmem>>, vector<1x128xf32>,
    %c0_43 = arith.constant 0 : index
    %c0_44 = arith.constant 0 : index
    %107 = vector.load %arg11[%c0_43, %c0_44] : memref<1x128xf32, #tpu.memory_space<vmem>>, vector<1x128xf32>
    %108 = arith.addf %107, %92 : vector<1x128xf32>
    %c0_45 = arith.constant 0 : index
    %c0_46 = arith.constant 0 : index
    %109 = vector.load %arg11[%c0_45, %c0_46] : memref<1x128xf32, #tpu.memory_space<vmem>>, vector<1x128xf32>
    tpu.vector_store %arg11[%c0_45, %c0_46], %108 {strides = array<i32>} : memref<1x128xf32, #tpu.memory_space<vmem>>, vector<1x128xf32>,
    %c0_47 = arith.constant 0 : index
    %c0_48 = arith.constant 0 : index
    %110 = vector.load %arg12[%c0_47, %c0_48] : memref<1x128xf32, #tpu.memory_space<vmem>>, vector<1x128xf32>
    %111 = arith.mulf %92, %87 : vector<1x128xf32>
    %112 = arith.addf %110, %111 : vector<1x128xf32>
    %c0_49 = arith.constant 0 : index
    %c0_50 = arith.constant 0 : index
    %113 = vector.load %arg12[%c0_49, %c0_50] : memref<1x128xf32, #tpu.memory_space<vmem>>, vector<1x128xf32>
    tpu.vector_store %arg12[%c0_49, %c0_50], %112 {strides = array<i32>} : memref<1x128xf32, #tpu.memory_space<vmem>>, vector<1x128xf32>,
    %c0_51 = arith.constant 0 : index
    %c0_52 = arith.constant 0 : index
    %114 = vector.load %arg13[%c0_51, %c0_52] : memref<1x128xf32, #tpu.memory_space<vmem>>, vector<1x128xf32>
    %115 = arith.addf %114, %93 : vector<1x128xf32>
    %c0_53 = arith.constant 0 : index
    %c0_54 = arith.constant 0 : index
    %116 = vector.load %arg13[%c0_53, %c0_54] : memref<1x128xf32, #tpu.memory_space<vmem>>, vector<1x128xf32>
    tpu.vector_store %arg13[%c0_53, %c0_54], %115 {strides = array<i32>} : memref<1x128xf32, #tpu.memory_space<vmem>>, vector<1x128xf32>,
    %c0_55 = arith.constant 0 : index
    %c0_56 = arith.constant 0 : index
    %117 = vector.load %arg14[%c0_55, %c0_56] : memref<1x128xf32, #tpu.memory_space<vmem>>, vector<1x128xf32>
    %118 = arith.mulf %93, %87 : vector<1x128xf32>
    %119 = arith.addf %117, %118 : vector<1x128xf32>
    %c0_57 = arith.constant 0 : index
    %c0_58 = arith.constant 0 : index
    %120 = vector.load %arg14[%c0_57, %c0_58] : memref<1x128xf32, #tpu.memory_space<vmem>>, vector<1x128xf32>
    tpu.vector_store %arg14[%c0_57, %c0_58], %119 {strides = array<i32>} : memref<1x128xf32, #tpu.memory_space<vmem>>, vector<1x128xf32>,
    %c0_i32_59 = arith.constant 0 : i32
    %121 = arith.cmpi eq, %arg0, %c0_i32_59 : i32
    %122 = arith.extui %121 : i1 to i32
    %c0_i32_60 = arith.constant 0 : i32
    %123 = arith.cmpi ne, %122, %c0_i32_60 : i32
    scf.if %123 {
      %c0_61 = arith.constant 0 : index
      %c0_62 = arith.constant 0 : index
      %124 = vector.load %arg7[%c0_61, %c0_62] : memref<1x128xf32, #tpu.memory_space<vmem>>, vector<1x128xf32>
      %cst_63 = arith.constant dense<0.000000e+00> : vector<128xf32>
      %125 = vector.multi_reduction <add>, %124, %cst_63 [0] : vector<1x128xf32> to vector<128xf32>
      %126 = vector.shape_cast %125 : vector<128xf32> to vector<1x128xf32>
      %cst_64 = arith.constant dense<0.000000e+00> : vector<1xf32>
      %127 = vector.multi_reduction <add>, %126, %cst_64 [1] : vector<1x128xf32> to vector<1xf32>
      %128 = vector.shape_cast %127 : vector<1xf32> to vector<1x1xf32>
      %c0_65 = arith.constant 0 : index
      %c0_66 = arith.constant 0 : index
      %129 = vector.load %arg8[%c0_65, %c0_66] : memref<1x128xf32, #tpu.memory_space<vmem>>, vector<1x128xf32>
      %cst_67 = arith.constant dense<0.000000e+00> : vector<128xf32>
      %130 = vector.multi_reduction <add>, %129, %cst_67 [0] : vector<1x128xf32> to vector<128xf32>
      %131 = vector.shape_cast %130 : vector<128xf32> to vector<1x128xf32>
      %cst_68 = arith.constant dense<0.000000e+00> : vector<1xf32>
      %132 = vector.multi_reduction <add>, %131, %cst_68 [1] : vector<1x128xf32> to vector<1xf32>
      %133 = vector.shape_cast %132 : vector<1xf32> to vector<1x1xf32>
      %c0_69 = arith.constant 0 : index
      %c0_70 = arith.constant 0 : index
      %134 = vector.load %arg9[%c0_69, %c0_70] : memref<1x128xf32, #tpu.memory_space<vmem>>, vector<1x128xf32>
      %cst_71 = arith.constant dense<0.000000e+00> : vector<128xf32>
      %135 = vector.multi_reduction <add>, %134, %cst_71 [0] : vector<1x128xf32> to vector<128xf32>
      %136 = vector.shape_cast %135 : vector<128xf32> to vector<1x128xf32>
      %cst_72 = arith.constant dense<0.000000e+00> : vector<1xf32>
      %137 = vector.multi_reduction <add>, %136, %cst_72 [1] : vector<1x128xf32> to vector<1xf32>
      %138 = vector.shape_cast %137 : vector<1xf32> to vector<1x1xf32>
      %c0_73 = arith.constant 0 : index
      %c0_74 = arith.constant 0 : index
      %139 = vector.load %arg10[%c0_73, %c0_74] : memref<1x128xf32, #tpu.memory_space<vmem>>, vector<1x128xf32>
      %cst_75 = arith.constant dense<0.000000e+00> : vector<128xf32>
      %140 = vector.multi_reduction <add>, %139, %cst_75 [0] : vector<1x128xf32> to vector<128xf32>
      %141 = vector.shape_cast %140 : vector<128xf32> to vector<1x128xf32>
      %cst_76 = arith.constant dense<0.000000e+00> : vector<1xf32>
      %142 = vector.multi_reduction <add>, %141, %cst_76 [1] : vector<1x128xf32> to vector<1xf32>
      %143 = vector.shape_cast %142 : vector<1xf32> to vector<1x1xf32>
      %c0_77 = arith.constant 0 : index
      %c0_78 = arith.constant 0 : index
      %144 = vector.load %arg11[%c0_77, %c0_78] : memref<1x128xf32, #tpu.memory_space<vmem>>, vector<1x128xf32>
      %cst_79 = arith.constant dense<0.000000e+00> : vector<128xf32>
      %145 = vector.multi_reduction <add>, %144, %cst_79 [0] : vector<1x128xf32> to vector<128xf32>
      %146 = vector.shape_cast %145 : vector<128xf32> to vector<1x128xf32>
      %cst_80 = arith.constant dense<0.000000e+00> : vector<1xf32>
      %147 = vector.multi_reduction <add>, %146, %cst_80 [1] : vector<1x128xf32> to vector<1xf32>
      %148 = vector.shape_cast %147 : vector<1xf32> to vector<1x1xf32>
      %c0_81 = arith.constant 0 : index
      %c0_82 = arith.constant 0 : index
      %149 = vector.load %arg12[%c0_81, %c0_82] : memref<1x128xf32, #tpu.memory_space<vmem>>, vector<1x128xf32>
      %cst_83 = arith.constant dense<0.000000e+00> : vector<128xf32>
      %150 = vector.multi_reduction <add>, %149, %cst_83 [0] : vector<1x128xf32> to vector<128xf32>
      %151 = vector.shape_cast %150 : vector<128xf32> to vector<1x128xf32>
      %cst_84 = arith.constant dense<0.000000e+00> : vector<1xf32>
      %152 = vector.multi_reduction <add>, %151, %cst_84 [1] : vector<1x128xf32> to vector<1xf32>
      %153 = vector.shape_cast %152 : vector<1xf32> to vector<1x1xf32>
      %c0_85 = arith.constant 0 : index
      %c0_86 = arith.constant 0 : index
      %154 = vector.load %arg13[%c0_85, %c0_86] : memref<1x128xf32, #tpu.memory_space<vmem>>, vector<1x128xf32>
      %cst_87 = arith.constant dense<0.000000e+00> : vector<128xf32>
      %155 = vector.multi_reduction <add>, %154, %cst_87 [0] : vector<1x128xf32> to vector<128xf32>
      %156 = vector.shape_cast %155 : vector<128xf32> to vector<1x128xf32>
      %cst_88 = arith.constant dense<0.000000e+00> : vector<1xf32>
      %157 = vector.multi_reduction <add>, %156, %cst_88 [1] : vector<1x128xf32> to vector<1xf32>
      %158 = vector.shape_cast %157 : vector<1xf32> to vector<1x1xf32>
      %c0_89 = arith.constant 0 : index
      %c0_90 = arith.constant 0 : index
      %159 = vector.load %arg14[%c0_89, %c0_90] : memref<1x128xf32, #tpu.memory_space<vmem>>, vector<1x128xf32>
      %cst_91 = arith.constant dense<0.000000e+00> : vector<128xf32>
      %160 = vector.multi_reduction <add>, %159, %cst_91 [0] : vector<1x128xf32> to vector<128xf32>
      %161 = vector.shape_cast %160 : vector<128xf32> to vector<1x128xf32>
      %cst_92 = arith.constant dense<0.000000e+00> : vector<1xf32>
      %162 = vector.multi_reduction <add>, %161, %cst_92 [1] : vector<1x128xf32> to vector<1xf32>
      %163 = vector.shape_cast %162 : vector<1xf32> to vector<1x1xf32>
      %164 = arith.sitofp %3 : i32 to f32
      %165 = vector.broadcast %164 : f32 to vector<1x1xf32>
      %166 = arith.subf %165, %133 : vector<1x1xf32>
      %167 = arith.subf %138, %143 : vector<1x1xf32>
      %168 = arith.subf %148, %153 : vector<1x1xf32>
      %169 = arith.subf %158, %163 : vector<1x1xf32>
      %170 = vector.broadcast %164 : f32 to vector<1x1xf32>
      %171 = arith.divf %128, %170 : vector<1x1xf32>
      %cst_93 = arith.constant 1.000000e+00 : f32
      %172 = vector.broadcast %cst_93 : f32 to vector<1x1xf32>
      %173 = arith.maximumf %166, %172 : vector<1x1xf32>
      %174 = arith.divf %167, %173 : vector<1x1xf32>
      %cst_94 = arith.constant 1.000000e+00 : f32
      %175 = vector.broadcast %cst_94 : f32 to vector<1x1xf32>
      %176 = arith.maximumf %133, %175 : vector<1x1xf32>
      %177 = arith.divf %143, %176 : vector<1x1xf32>
      %178 = arith.subf %174, %177 : vector<1x1xf32>
      %179 = math.absf %178 : vector<1x1xf32>
      %cst_95 = arith.constant 0.000000e+00 : f32
      %180 = vector.broadcast %cst_95 : f32 to vector<1x1xf32>
      %181 = arith.cmpf ogt, %168, %180 : vector<1x1xf32>
      %cst_96 = arith.constant 1.000000e+00 : f32
      %182 = vector.broadcast %cst_96 : f32 to vector<1x1xf32>
      %183 = arith.maximumf %168, %182 : vector<1x1xf32>
      %184 = arith.divf %169, %183 : vector<1x1xf32>
      %cst_97 = arith.constant 0.000000e+00 : f32
      %185 = vector.broadcast %cst_97 : f32 to vector<1x1xf32>
      %186 = arith.select %181, %184, %185 : vector<1x1xi1>, vector<1x1xf32>
      %cst_98 = arith.constant 0.000000e+00 : f32
      %187 = vector.broadcast %cst_98 : f32 to vector<1x1xf32>
      %188 = arith.cmpf ogt, %153, %187 : vector<1x1xf32>
      %cst_99 = arith.constant 1.000000e+00 : f32
      %189 = vector.broadcast %cst_99 : f32 to vector<1x1xf32>
      %190 = arith.maximumf %153, %189 : vector<1x1xf32>
      %191 = arith.divf %163, %190 : vector<1x1xf32>
      %cst_100 = arith.constant 0.000000e+00 : f32
      %192 = vector.broadcast %cst_100 : f32 to vector<1x1xf32>
      %193 = arith.select %188, %191, %192 : vector<1x1xi1>, vector<1x1xf32>
      %194 = arith.subf %186, %193 : vector<1x1xf32>
      %195 = math.absf %194 : vector<1x1xf32>
      %c0_101 = arith.constant 0 : index
      %196 = memref.load %arg5[%c0_101] : memref<1xf32, #tpu.memory_space<smem>>
      %197 = arith.addf %179, %195 : vector<1x1xf32>
      %198 = vector.broadcast %196 : f32 to vector<1x1xf32>
      %199 = arith.mulf %198, %197 : vector<1x1xf32>
      %200 = arith.addf %171, %199 : vector<1x1xf32>
      %c0_102 = arith.constant 0 : index
      %c0_103 = arith.constant 0 : index
      %201 = vector.load %arg6[%c0_102, %c0_103] : memref<1x1xf32, #tpu.memory_space<vmem>>, vector<1x1xf32>
      tpu.vector_store %arg6[%c0_102, %c0_103], %200 {strides = array<i32>} : memref<1x1xf32, #tpu.memory_space<vmem>>, vector<1x1xf32>,
    } else {
    }
    return
  }
  func.func @transform_0(%arg0: i32) -> (i32, i32, i32) {
    %c0_i32 = arith.constant 0 : i32
    %c0_i32_0 = arith.constant 0 : i32
    %c0_i32_1 = arith.constant 0 : i32
    return %c0_i32, %arg0, %c0_i32_0 : i32, i32, i32
  }
  func.func @transform_1(%arg0: i32) -> (i32, i32) {
    %c0_i32 = arith.constant 0 : i32
    %c0_i32_0 = arith.constant 0 : i32
    return %arg0, %c0_i32 : i32, i32
  }
  func.func @transform_2(%arg0: i32) -> (i32, i32) {
    %c0_i32 = arith.constant 0 : i32
    %c0_i32_0 = arith.constant 0 : i32
    return %arg0, %c0_i32 : i32, i32
  }
  func.func @transform_3(%arg0: i32) -> i32 {
    %c0_i32 = arith.constant 0 : i32
    %c0_i32_0 = arith.constant 0 : i32
    return %c0_i32 : i32
  }
  func.func @transform_4(%arg0: i32) -> i32 {
    %c0_i32 = arith.constant 0 : i32
    %c0_i32_0 = arith.constant 0 : i32
    return %c0_i32 : i32
  }
  func.func @transform_5(%arg0: i32) -> (i32, i32) {
    %c0_i32 = arith.constant 0 : i32
    %c0_i32_0 = arith.constant 0 : i32
    %c0_i32_1 = arith.constant 0 : i32
    return %c0_i32, %c0_i32_0 : i32, i32
  }
}

</mosaic_0001>

<bundles_post_ra>
// kernel: tpu_custom_call.1
= control target key start
LH: loop header
LB: loop body
LE: loop exit
PB: predicated region body
PF: predicated region fallthrough
CT: control target
= control target key end

     0   :  { %v40_v1 = vlaneseq  ;;  %v285_v2 = vmov 0.0   ;;  %s428_s0 = inlined_call_operand.vmem [shape: f32[4,1,128], index: 0, kind: input, shape index: {}]   ;;  %s429_s1 = inlined_call_operand.vmem [shape: s8[1,128], index: 1, kind: input, shape index: {}]   ;;  %s430_s2 = inlined_call_operand.vmem [shape: s8[1,128], index: 2, kind: input, shape index: {}]   ;;  %s431_s3 = inlined_call_operand.<no memory space> [shape: s32[1], index: 3, kind: input, shape index: {}]   ;;  %s432_s4 = inlined_call_operand.<no memory space> [shape: f32[1], index: 4, kind: input, shape index: {}]   ;;  %s433_s5 = inlined_call_operand.hbm [shape: f32[1,1], index: 5, kind: output, shape index: {}]  }
   0x1   :  { %v36_v0 = vld [vmem:[%s429_s1] sm:$0x1]  ;;  %31 = vst [vmem:[#allocation6] sm:$0x1] %v285_v2  ;;  %27 = vst [vmem:[#allocation2] sm:$0x1] %v285_v2 }
   0x2   :  { %28 = vst [vmem:[#allocation3] sm:$0x1] %v285_v2  ;;  %29 = vst [vmem:[#allocation4] sm:$0x1] %v285_v2  ;;  %v328_v3 = vunpack.c.0.s8 %v36_v0  ;;  %v41_v4 = vshrl.u32 %v40_v1, 7  ;;  %v43_v5 = vand.u32 127, %v40_v1 }
   0x3   :  { %30 = vst [vmem:[#allocation5] sm:$0x1] %v285_v2  ;;  %32 = vst [vmem:[#allocation7] sm:$0x1] %v285_v2  ;;  %v38_v6 = vld [vmem:[%s430_s2] sm:$0x1] }
   0x4   :  { %33 = vst [vmem:[#allocation8] sm:$0x1] %v285_v2  ;;  %34 = vst [vmem:[#allocation9] sm:$0x1] %v285_v2 }
   0x5   :  { %12 = vsyncpa [#allocation13], 0  ;;  %v39_v7 = vunpack.c.0.s8 %v38_v6  ;;  %v45_v8 = vmul.u32 128, %v41_v4  ;;  %v49_v9 = vstv %s431_s3  ;;  %v53_v10 = vld [vmem:[%s428_s0] sm:$0x1]  ;;  %vm78_vm0 = vcmp.eq.s32.totalorder %v328_v3, 1  ;;  %s185_s6 = scvt.s32.f32 %s431_s3 }
   0x6   :  { %v235_v12 = vld [vmem:[%s428_s0 + $0x1] sm:$0x1]  ;;  %v236_v13 = vld [vmem:[%s428_s0 + $0x2] sm:$0x1]  ;;  %v237_v15 = vld [vmem:[%s428_s0 + $0x3] sm:$0x1] }
   0x7   :  { %v48_v11 = vadd.s32 %v45_v8, %v43_v5  ;;  %vm106_vm1 = vcmp.eq.s32.totalorder %v39_v7, 1  ;;  %vm146_vm9 = vcmask 1040384   ;;  %vm71_vm10 = vcmp.eq.s32.totalorder %v328_v3, 0  ;;  %s286_s8 = smov [#allocation12]  }
   0x8   :  { %v127_v16 = vld [vmem:[#allocation6] sm:$0x1]  ;;  %vm85_vm11 = vcmp.eq.s32.totalorder %v328_v3, 2  ;;  %vm92_vm12 = vcmp.eq.s32.totalorder %v328_v3, 3  ;;  %s226_s9 = sshll.u32 %s286_s8, 4  ;;  %vm218_vm15 = vcmask 0   ;;  %s227_s9 = int_to_ptr.vmem [resolvable:$true] %s226_s9 }
   0x9   :  { %vm346_vm2 = vcmp.lt.s32.totalorder %v48_v11, %v49_v9  ;;  %v117_v20 = vld [vmem:[#allocation3] sm:$0x1]  ;;  %v120_v36 = vld [vmem:[#allocation4] sm:$0x1]  ;;  %s263_s10 = scalar_lea.vmem %s227_s9, 16  ;;  %s267_s11 = scalar_lea.vmem %s227_s9, 32 }
   0xa   :  { %v355_v17 = vsel %vm346_vm2, %v53_v10, 0.0  ;;  %v359_v18 = vsel %vm346_vm2, %v235_v12, 0.0  ;;  %v363_v19 = vsel %vm346_vm2, %v236_v13, 0.0  ;;  %vm110_vm3 = vmand %vm78_vm0, %vm346_vm2  ;;  %v375_v22 = vsel %vm346_vm2, %v237_v15, 0.0  ;;  %v130_v25 = vld [vmem:[#allocation7] sm:$0x1]  ;;  %p264_p0 = scmp.ne.s32.totalorder %s227_s9, %s263_s10  ;;  %p268_p1 = scmp.lt.s32.totalorder %s227_s9, %s227_s9 }
   0xb   :  { %v64_v21 = vmax.f32 %v355_v17, %v359_v18  ;;  %vm107_vm4 = vmand %vm106_vm1, %vm346_vm2  ;;  %v240_v23 = vsel %vm110_vm3, 1.0, %v285_v2  ;;  %v134_v42 = vld [vmem:[#allocation8] sm:$0x1]  ;;  %v123_v43 = vld [vmem:[#allocation5] sm:$0x1]  ;;  %v72_v11 = vsel %vm71_vm10, %v355_v17, 0.0  ;;  %p269_p2 = scmp.lt.s32.totalorder %s267_s11, %s263_s10 }
   0xc   :  { %v239_v24 = vsel %vm107_vm4, 1.0, %v285_v2  ;;  %v128_v27 = vadd.f32 %v240_v23, %v127_v16  ;;  %v137_v51 = vld [vmem:[#allocation9] sm:$0x1]  ;;  %v79_v12 = vsel %vm78_vm0, %v359_v18, 0.0  ;;  %v86_v15 = vsel %vm85_vm11, %v363_v19, 0.0 }
   0xd   :  { %v65_v26 = vmax.f32 %v64_v21, %v363_v19  ;;  %v131_v28 = vmul.f32 %v240_v23, %v239_v24  ;;  %v118_v29 = vadd.f32 %v239_v24, %v117_v20  ;;  %v80_v13 = vadd.f32 %v79_v12, %v72_v11  ;;  %p270_p3 = por %p269_p2, %p268_p1 }
   0xe   :  { %129 = vst [vmem:[#allocation6] sm:$0x1] %v128_v27  ;;  %v93_v20 = vsel %vm92_vm12, %v375_v22, 0.0 }
   0xf   :  { %v381_v30 = vmax.f32 %v65_v26, %v375_v22  ;;  %v132_v31 = vadd.f32 %v131_v28, %v130_v25  ;;  %119 = vst [vmem:[#allocation3] sm:$0x1] %v118_v29  ;;  %v87_v16 = vadd.f32 %v86_v15, %v80_v13  ;;  %v114_v26 = vld [vmem:[#allocation2] sm:$0x1]  ;;  %p271_p4 = pnand %p270_p3, %p264_p0 }
  0x11   :  { %v67_v32 = vsub.f32 %v355_v17, %v381_v30  ;;  %v74_v33 = vsub.f32 %v359_v18, %v381_v30  ;;  %v81_v34 = vsub.f32 %v363_v19, %v381_v30  ;;  %v88_v35 = vsub.f32 %v375_v22, %v381_v30  ;;  %133 = vst [vmem:[#allocation7] sm:$0x1] %v132_v31 }
  0x12   :  { %vm100_vm5 = vcmp.eq.f32.partialorder %v359_v18, %v381_v30  ;;  %vm101_vm6 = vcmp.lt.f32.partialorder %v355_v17, %v381_v30  ;;  %v234_v17 = vsel %vm346_vm2, 1.0, %v285_v2  ;;  %v186_v31 = vstv %s185_s6 }
  0x13   :  { %v68_v37 = vmul.f32 1.442695, %v67_v32  ;;  %v75_v38 = vmul.f32 1.442695, %v74_v33  ;;  %v82_v39 = vmul.f32 1.442695, %v81_v34  ;;  %vm102_vm7 = vmand %vm100_vm5, %vm101_vm6 }
  0x14   :  { %v89_v40 = vmul.f32 1.442695, %v88_v35  ;;  %vm103_vm8 = vmand %vm102_vm7, %vm346_vm2 }
  0x15   :  { %243 = vpow2.f32 %v68_v37  ;;  %v238_v41 = vsel %vm103_vm8, 1.0, %v285_v2  ;;  %v165_v45 = vld [vmem:[#allocation6] sm:$0x1] }
  0x16   :  { %245 = vpow2.f32 %v75_v38  ;;  %v113_v44 = vmul.f32 %v240_v23, %v238_v41  ;;  %v150_v46 = vld [vmem:[#allocation3] sm:$0x1]  ;;  %v124_v47 = vmul.f32 %v239_v24, %v238_v41  ;;  %v121_v48 = vadd.f32 %v238_v41, %v120_v36 }
  0x17   :  { %247 = vpow2.f32 %v82_v39  ;;  %v167_v49 = vsel %vm146_vm9, %v165_v45, 0.0  ;;  %v152_v50 = vsel %vm146_vm9, %v150_v46, 0.0  ;;  %v94_v23 = vadd.f32 %v93_v20, %v87_v16 }
  0x18   :  { %249 = vpow2.f32 %v89_v40  ;;  %168 = vadd.xlane.f32.xlu0 %v167_v49  ;;  %v170_v52 = vld [vmem:[#allocation7] sm:$0x1]  ;;  %153 = vadd.xlane.f32.xlu1 %v152_v50  ;;  %v138_v53 = vmul.f32 %v239_v24, %v113_v44  ;;  %v135_v54 = vadd.f32 %v134_v42, %v113_v44  ;;  %v125_v55 = vadd.f32 %v124_v47, %v123_v43 }
  0x19   :  { %122 = vst [vmem:[#allocation4] sm:$0x1] %v121_v48  ;;  %v172_v56 = vsel %vm146_vm9, %v170_v52, 0.0 }
  0x1a   :  { %v139_v57 = vadd.f32 %v138_v53, %v137_v51  ;;  %136 = vst [vmem:[#allocation8] sm:$0x1] %v135_v54  ;;  %126 = vst [vmem:[#allocation5] sm:$0x1] %v125_v55 }
  0x1c   :  { %173 = vadd.xlane.f32.xlu0 %v172_v56  ;;  %140 = vst [vmem:[#allocation9] sm:$0x1] %v139_v57 }
  0x20   :  { %v155_v59 = vld [vmem:[#allocation4] sm:$0x1] }
  0x21   :  { %v175_v58 = vld [vmem:[#allocation8] sm:$0x1]  ;;  %v160_v0 = vld [vmem:[#allocation5] sm:$0x1]  ;;  %v157_v5 = vsel %vm146_vm9, %v155_v59, 0.0 }
  0x22   :  { %v244_v60 = vpop.eup %243  ;;  %v177_v61 = vsel %vm146_vm9, %v175_v58, 0.0  ;;  %v162_v8 = vsel %vm146_vm9, %v160_v0, 0.0  ;;  %v215_v58 = vstv %s432_s4 }
  0x23   :  { %v246_v62 = vpop.eup %245  ;;  %v180_v63 = vld [vmem:[#allocation9] sm:$0x1]  ;;  %178 = vadd.xlane.f32.xlu1 %v177_v61 }
  0x24   :  { %v248_v1 = vpop.eup %247  ;;  %v182_v4 = vsel %vm146_vm9, %v180_v63, 0.0  ;;  %v77_v6 = vadd.f32 %v246_v62, %v244_v60 }
  0x25   :  { %v250_v7 = vpop.eup %249  ;;  %183 = vadd.xlane.f32.xlu0 %v182_v4 }
  0x26   :  { %v84_v9 = vadd.f32 %v248_v1, %v77_v6 }
  0x27   :  { %158 = vadd.xlane.f32.xlu1 %v157_v5 }
  0x28   :  { %v91_v10 = vadd.f32 %v250_v7, %v84_v9 }
  0x29   :  { %163 = vadd.xlane.f32.xlu0 %v162_v8 }
  0x2a   :  { %251 = vlog2.f32 %v91_v10 }
  0x37   :  { %v252_v21 = vpop.eup %251 }
  0x38   :  { %v96_v24 = vmul.f32 0.6931472, %v252_v21 }
  0x3a   :  { %v97_v25 = vadd.f32 %v96_v24, %v381_v30 }
  0x3c   :  { %v98_v18 = vsub.f32 %v97_v25, %v94_v23 }
  0x3e   :  { %v99_v27 = vmul.f32 %v234_v17, %v98_v18 }
  0x40   :  { %v115_v28 = vadd.f32 %v114_v26, %v99_v27 }
  0x42   :  { %116 = vst [vmem:[#allocation2] sm:$0x1] %v115_v28 }
  0x49   :  { %v144_v19 = vld [vmem:[#allocation2] sm:$0x1] }
  0x4a   :  { %v147_v3 = vsel %vm146_vm9, %v144_v19, 0.0 }
  0x4b   :  { %148 = vadd.xlane.f32.xlu1 %v147_v3 }
  0xa1   :  { %v169_v29 = vpop.xlane.xlu0 %168  ;;  %v154_v32 = vpop.xlane.xlu1 %153 }
  0xa2   :  { %v187_v2 = vsub.f32 %v186_v31, %v154_v32  ;;  %v196_v34 = vmax.f32 %v154_v32, 1.0 }
  0xa4   :  { %v193_v35 = vmax.f32 %v187_v2, 1.0 }
  0xa5   :  { %v174_v22 = vpop.xlane.xlu0 %173 }
  0xa6   :  { %v189_v30 = vsub.f32 %v169_v29, %v174_v22  ;;  %v207_v14 = vmax.f32 %v174_v22, 1.0  ;;  %vm206_vm13 = vcmp.gt.f32.partialorder %v174_v22, 0.0 }
  0xa8   :  { %v202_v33 = vmax.f32 %v189_v30, 1.0  ;;  %253 = vrcp.f32 %v207_v14  ;;  %vm201_vm14 = vcmp.gt.f32.partialorder %v189_v30, 0.0 }
  0xaa   :  { %255 = vrcp.f32 %v202_v33 }
  0xab   :  { %257 = vrcp.f32 %v196_v34 }
  0xac   :  { %259 = vrcp.f32 %v193_v35  ;;  %v179_v37 = vpop.xlane.xlu1 %178 }
  0xad   :  { %261 = vrcp.f32 %v186_v31 }
  0xae   :  { %v184_v36 = vpop.xlane.xlu0 %183 }
  0xaf   :  { %v190_v39 = vsub.f32 %v179_v37, %v184_v36 }
  0xb0   :  { %v159_v41 = vpop.xlane.xlu1 %158 }
  0xb2   :  { %v164_v40 = vpop.xlane.xlu0 %163 }
  0xb3   :  { %v188_v44 = vsub.f32 %v159_v41, %v164_v40 }
  0xb5   :  { %v254_v38 = vpop.eup %253 }
  0xb6   :  { %v209_v46 = vmul.f32 %v254_v38, %v184_v36 }
  0xb7   :  { %v256_v42 = vpop.eup %255 }
  0xb8   :  { %v258_v43 = vpop.eup %257  ;;  %v204_v47 = vmul.f32 %v256_v42, %v190_v39  ;;  %v210_v50 = vsel %vm206_vm13, %v209_v46, 0.0 }
  0xb9   :  { %v260_v45 = vpop.eup %259  ;;  %v198_v48 = vmul.f32 %v258_v43, %v164_v40 }
  0xba   :  { %v195_v49 = vmul.f32 %v260_v45, %v188_v44  ;;  %v205_v51 = vsel %vm201_vm14, %v204_v47, 0.0  ;;  %v262_v57 = vpop.eup %261 }
  0xbb   :  { %v211_v52 = vsub.f32 %v205_v51, %v210_v50 }
  0xbc   :  { %v199_v53 = vsub.f32 %v195_v49, %v198_v48 }
  0xbd   :  { %v212_v54 = vand.u32 2147483647, %v211_v52 }
  0xbe   :  { %v200_v55 = vand.u32 2147483647, %v199_v53 }
  0xc0   :  { %v214_v56 = vadd.f32 %v212_v54, %v200_v55 }
  0xc2   :  { %v216_v60 = vmul.f32 %v215_v58, %v214_v56 }
  0xd4   :  { %v149_v59 = vpop.xlane.xlu1 %148 }
  0xd5   :  { %v192_v61 = vmul.f32 %v262_v57, %v149_v59 }
  0xd7   :  { %v217_v62 = vadd.f32 %v216_v60, %v192_v61 }
  0xd9   :  { %219 = vst.msk [vmem:[#allocation12] sm:$0x1] %vm218_vm15, %v217_v62 }
  0xda   :  { %274 = shalt.err (!%p271_p4)
}
  0xdb   :  { %229 = dma.vmem_to_hbm [thread:$0]  %s227_s9, 16, %s433_s5, [#allocation13]  }
  0xdc   :  { %283 = dma.done.wait [#allocation13], 16  }
  0xdd   :  { %284 = vsyncadd [#allocation13], 4294967280 }
  0xde   :  { %233 = vsyncpa [#allocation13], 1 }

</bundles_post_ra>
